<compile_context>
chip_gen: v6e
topology: v6e:2x2x1
jax: 0.10.0
libtpu: 0.0.40
codegen_flags: <defaults>
</compile_context>

<pallas_src>
import functools

import jax
import jax.numpy as jnp
import numpy as np
from jax.experimental import pallas as pl
from jax.experimental.pallas import tpu as pltpu


def _round_up(x, m):
    return ((x + m - 1) // m) * m


# ----------------------------- Pallas kernel --------------------------------
def _concept_mlp_kernel(x_ref, *refs, num_layers, compute_dtype):
    # refs layout: (w_0, b_0, w_1, b_1, ..., w_{L-1}, b_{L-1}, o_ref)
    w_refs = refs[0:2 * num_layers:2]
    b_refs = refs[1:2 * num_layers:2]
    o_ref = refs[2 * num_layers]

    h = x_ref[...].astype(compute_dtype)              # (TILE_B, C) bf16, cast in VMEM
    for li in range(num_layers):                      # static unrolled layer loop
        y = jnp.dot(h, w_refs[li][...],
                    preferred_element_type=jnp.float32)   # MXU, f32 accumulation
        y = y + b_refs[li][...]                       # folded Linear+BN bias (f32)
        if li < num_layers - 1:
            # ReLU + bf16 carry: half-size inter-layer value; the f32->bf16 cast
            # sits next to the ReLU where the VPU slot has slack.  Padded lanes
            # stay exactly 0 (padded bias entries are 0 and ReLU(0) == 0).
            h = jnp.maximum(y, 0.0).astype(compute_dtype)
        else:
            h = y                                     # final logits stay f32
    o_ref[...] = h.astype(o_ref.dtype)


# --------------------------- ConceptMLP wrapper ------------------------------
class ConceptMLPPallas:
    """Inference-mode ConceptMLP. Parameters are created deterministically."""

    def __init__(self, num_concepts, num_classes, mlp_dims, p_dropout,
                 batchnorm=True, seed=0, compute_dtype=jnp.bfloat16):
        self.num_concepts = num_concepts
        self.num_classes = num_classes
        self.mlp_dims = tuple(mlp_dims)
        self.batchnorm = batchnorm
        self.compute_dtype = compute_dtype
        self.p_dropout = p_dropout  # TODO(synk): training-mode dropout not implemented (eval => identity)
        self.eps = 1e-5

        dims = list(self.mlp_dims) + [num_classes]
        key = jax.random.PRNGKey(seed)
        self.w_pad = []   # weights, compute_dtype, BN folded in
        self.b_pad = []   # (1, dout) float32 biases, BN folded in
        prev, prev_pad = num_concepts, num_concepts   # layer-0 input stays UNPADDED
        for li, dim in enumerate(dims):
            key, kw, kb, kg, kbeta, km, kv = jax.random.split(key, 7)
            # PyTorch Linear default init: U(-1/sqrt(fan_in), 1/sqrt(fan_in)).
            bound = 1.0 / np.sqrt(prev)
            w = jax.random.uniform(kw, (prev, dim), jnp.float32, -bound, bound)
            b = jax.random.uniform(kb, (dim,), jnp.float32, -bound, bound)

            is_hidden = li < len(self.mlp_dims)
            if is_hidden and self.batchnorm:
                gamma = 1.0 + 0.1 * jax.random.normal(kg, (dim,), jnp.float32)
                beta = 0.1 * jax.random.normal(kbeta, (dim,), jnp.float32)
                run_mean = 0.1 * jax.random.normal(km, (dim,), jnp.float32)
                run_var = jnp.abs(jax.random.normal(kv, (dim,), jnp.float32)) + 0.5
                scale = gamma / jnp.sqrt(run_var + self.eps)
                shift = beta - run_mean * scale
                # Fold eval-mode BatchNorm affine into the Linear (setup-time).
                w = w * scale[None, :]
                b = b * scale + shift

            # Hidden layers: pad output dim to 128 lanes (lane-dense MXU/VPU work;
            # zero padded lanes are numerically inert under ReLU).
            # Final layer: keep num_classes unpadded -> narrow, tiny writeback.
            dout_pad = _round_up(dim, 128) if is_hidden else dim
            wp = jnp.zeros((prev_pad, dout_pad), jnp.float32).at[:prev, :dim].set(w)
            bp = jnp.zeros((1, dout_pad), jnp.float32).at[0, :dim].set(b)
            self.w_pad.append(wp.astype(compute_dtype))
            self.b_pad.append(bp)                      # epilogue stays f32
            prev, prev_pad = dim, dout_pad

    # ------------------------------ forward ---------------------------------
    def __call__(self, x):
        B = x.shape[0]

        # Batch tiling:
        #   * multiple of 16 rows (bf16 packs 2 rows/sublane -> fully packed tiles)
        #   * large tiles (cap 1024) to amortize ~0.35us/grid-step and feed the MXU
        #   * but >=2 grid steps when B allows, so the "parallel" axis shards
        #     across both TensorCores on v7x.
        tile_b = _round_up(B, 16)
        if tile_b >= 32:
            tile_b = _round_up(pl.cdiv(B, 2), 16)
        tile_b = min(tile_b, 1024)
        b_padded = _round_up(B, tile_b)

        # Feed x directly (no wrapper-side lane-padding / casting pass over the
        # activation stream); only pad batch rows if B is not a tile multiple.
        xp = x if b_padded == B else jnp.pad(x, ((0, b_padded - B), (0, 0)))

        try:
            out = self._forward_pallas(xp, tile_b, b_padded, buffered=True)
        except Exception:
            # pipeline_mode=pl.Buffered(1) unsupported on this jax version /
            # backend -> fall back to default double-buffered resident specs.
            out = self._forward_pallas(xp, tile_b, b_padded, buffered=False)

        return out[:B]

    def _forward_pallas(self, xp, tile_b, b_padded, buffered):
        num_layers = len(self.w_pad)
        num_concepts = xp.shape[1]

        def resident_spec(shape):
            # Constant index_map -> fetched once and kept resident; Buffered(1)
            # avoids allocating a useless second VMEM buffer (matters once hidden
            # dims grow, especially on v7x's 64 MiB VMEM).
            if buffered:
                return pl.BlockSpec(shape, lambda i: (0, 0),
                                    pipeline_mode=pl.Buffered(1))
            return pl.BlockSpec(shape, lambda i: (0, 0))

        in_specs = [pl.BlockSpec((tile_b, num_concepts), lambda i: (i, 0))]
        params = []
        for wp, bp in zip(self.w_pad, self.b_pad):
            in_specs.append(resident_spec(wp.shape))
            in_specs.append(resident_spec(bp.shape))
            params += [wp, bp]
        # Narrow (num_classes-wide) f32 output: block last dim == full array dim.
        out_spec = pl.BlockSpec((tile_b, self.num_classes), lambda i: (i, 0))

        kernel = functools.partial(_concept_mlp_kernel,
                                   num_layers=num_layers,
                                   compute_dtype=self.compute_dtype)

        # Scheduler hint.
        flops = sum(2 * b_padded * w.shape[0] * w.shape[1] for w in self.w_pad)
        bytes_accessed = (xp.size * xp.dtype.itemsize
                          + b_padded * self.num_classes * 4
                          + sum(w.size * w.dtype.itemsize for w in self.w_pad)
                          + sum(b.size * b.dtype.itemsize for b in self.b_pad))
        cost = pl.CostEstimate(flops=flops, transcendentals=0,
                               bytes_accessed=bytes_accessed)

        # VMEM budget: resident params (x2 in case of default double-buffering)
        # + pipelined x/out tiles + per-layer intermediates + headroom, capped
        # below the per-generation physical VMEM so Mosaic keeps internal scratch.
        param_bytes = 2 * (sum(w.size * w.dtype.itemsize for w in self.w_pad)
                           + sum(b.size * b.dtype.itemsize for b in self.b_pad))
        tile_bytes = 2 * tile_b * (num_concepts * xp.dtype.itemsize
                                   + self.num_classes * 4)
        inter_bytes = (2 * num_layers * tile_b
                       * max(w.shape[1] for w in self.w_pad) * 4)
        need = param_bytes + tile_bytes + inter_bytes + (8 << 20)
        try:
            cap = int(pltpu.get_tpu_info().vmem_capacity_bytes)
        except Exception:
            cap = 64 << 20   # conservative (v7x per-TC) if query unavailable
        vmem_limit = int(min(max(need, 32 << 20), cap - (16 << 20)))

        return pl.pallas_call(
            kernel,
            out_shape=jax.ShapeDtypeStruct((b_padded, self.num_classes),
                                           jnp.float32),
            grid=(b_padded // tile_b,),
            in_specs=in_specs,
            out_specs=out_spec,
            compiler_params=pltpu.CompilerParams(
                dimension_semantics=("parallel",),
                vmem_limit_bytes=vmem_limit),
            cost_estimate=cost,
        )(xp, *params)

    # --------------------------- pure-JAX reference --------------------------
    def reference(self, x):
        """Pure-JAX reference mirroring the kernel's numerics exactly."""
        num_layers = len(self.w_pad)
        h = x.astype(self.compute_dtype)
        for li, (w, b) in enumerate(zip(self.w_pad, self.b_pad)):
            y = jnp.dot(h, w, preferred_element_type=jnp.float32) + b
            if li < num_layers - 1:
                h = jnp.maximum(y, 0.0).astype(self.compute_dtype)
            else:
                h = y
        return h   # final layer is already num_classes wide (unpadded)


# ----------------------------------- main ------------------------------------
if __name__ == "__main__":
    batch = 8
    num_concepts = 32
    mlp_dims = (64, 32)
    num_classes = 8

    model = ConceptMLPPallas(num_concepts, num_classes, mlp_dims,
                             p_dropout=0.1, batchnorm=True, seed=0)

    key = jax.random.PRNGKey(0)
    x = jax.random.normal(key, (batch, num_concepts), jnp.float32)

    out = jax.block_until_ready(model(x))
    ref = jax.block_until_ready(model.reference(x))

    np.testing.assert_allclose(np.asarray(out), np.asarray(ref),
                               rtol=1e-3, atol=1e-3)
    assert out.shape == (batch, num_classes)

    print("KERNEL_OK")
</pallas_src>

<mosaic_0001>
module attributes {stable_mosaic.version = 11 : i64} {
  func.func @_concept_mlp_kernel(%arg0: i32, %arg1: memref<16x32xf32, #tpu.memory_space<vmem>>, %arg2: memref<32x128xbf16, #tpu.memory_space<vmem>>, %arg3: memref<1x128xf32, #tpu.memory_space<vmem>>, %arg4: memref<128x128xbf16, #tpu.memory_space<vmem>>, %arg5: memref<1x128xf32, #tpu.memory_space<vmem>>, %arg6: memref<128x8xbf16, #tpu.memory_space<vmem>>, %arg7: memref<1x8xf32, #tpu.memory_space<vmem>>, %arg8: memref<16x8xf32, #tpu.memory_space<vmem>>) attributes {dimension_semantics = [#tpu.dimension_semantics<parallel>], iteration_bounds = array<i64: 1>, scalar_prefetch = 0 : i64, scratch_operands = 0 : i64, tpu.core_type = #tpu.core_type<tc>, window_params = [{transform_indices = @transform_0, window_bounds = array<i64: 16, 32>}, {pipeline_mode = #tpu.pipeline_mode<synchronous>, transform_indices = @transform_1, window_bounds = array<i64: 32, 128>}, {pipeline_mode = #tpu.pipeline_mode<synchronous>, transform_indices = @transform_2, window_bounds = array<i64: 1, 128>}, {pipeline_mode = #tpu.pipeline_mode<synchronous>, transform_indices = @transform_3, window_bounds = array<i64: 128, 128>}, {pipeline_mode = #tpu.pipeline_mode<synchronous>, transform_indices = @transform_4, window_bounds = array<i64: 1, 128>}, {pipeline_mode = #tpu.pipeline_mode<synchronous>, transform_indices = @transform_5, window_bounds = array<i64: 128, 8>}, {pipeline_mode = #tpu.pipeline_mode<synchronous>, transform_indices = @transform_6, window_bounds = array<i64: 1, 8>}, {transform_indices = @transform_7, window_bounds = array<i64: 16, 8>}]} {
    %c0 = arith.constant 0 : index
    %c0_0 = arith.constant 0 : index
    %0 = vector.load %arg1[%c0, %c0_0] : memref<16x32xf32, #tpu.memory_space<vmem>>, vector<16x32xf32>
    %1 = arith.truncf %0 : vector<16x32xf32> to vector<16x32xbf16>
    %c0_1 = arith.constant 0 : index
    %c0_2 = arith.constant 0 : index
    %2 = vector.load %arg2[%c0_1, %c0_2] : memref<32x128xbf16, #tpu.memory_space<vmem>>, vector<32x128xbf16>
    %cst = arith.constant dense<0.000000e+00> : vector<16x128xf32>
    %3 = tpu.matmul %1, %2, %cst {dimension_numbers = #tpu.dot_dimension_numbers<[1], [0], [0], [1], [0, 0, 1, 1], [], []>} : vector<16x32xbf16>, vector<32x128xbf16>, vector<16x128xf32> -> vector<16x128xf32>
    %c0_3 = arith.constant 0 : index
    %c0_4 = arith.constant 0 : index
    %4 = vector.load %arg3[%c0_3, %c0_4] : memref<1x128xf32, #tpu.memory_space<vmem>>, vector<1x128xf32>
    %5 = vector.broadcast %4 : vector<1x128xf32> to vector<16x128xf32>
    %6 = arith.addf %3, %5 : vector<16x128xf32>
    %cst_5 = arith.constant 0.000000e+00 : f32
    %7 = vector.broadcast %cst_5 : f32 to vector<16x128xf32>
    %8 = arith.maximumf %6, %7 : vector<16x128xf32>
    %9 = arith.truncf %8 : vector<16x128xf32> to vector<16x128xbf16>
    %c0_6 = arith.constant 0 : index
    %c0_7 = arith.constant 0 : index
    %10 = vector.load %arg4[%c0_6, %c0_7] : memref<128x128xbf16, #tpu.memory_space<vmem>>, vector<128x128xbf16>
    %cst_8 = arith.constant dense<0.000000e+00> : vector<16x128xf32>
    %11 = tpu.matmul %9, %10, %cst_8 {dimension_numbers = #tpu.dot_dimension_numbers<[1], [0], [0], [1], [0, 0, 1, 1], [], []>} : vector<16x128xbf16>, vector<128x128xbf16>, vector<16x128xf32> -> vector<16x128xf32>
    %c0_9 = arith.constant 0 : index
    %c0_10 = arith.constant 0 : index
    %12 = vector.load %arg5[%c0_9, %c0_10] : memref<1x128xf32, #tpu.memory_space<vmem>>, vector<1x128xf32>
    %13 = vector.broadcast %12 : vector<1x128xf32> to vector<16x128xf32>
    %14 = arith.addf %11, %13 : vector<16x128xf32>
    %cst_11 = arith.constant 0.000000e+00 : f32
    %15 = vector.broadcast %cst_11 : f32 to vector<16x128xf32>
    %16 = arith.maximumf %14, %15 : vector<16x128xf32>
    %17 = arith.truncf %16 : vector<16x128xf32> to vector<16x128xbf16>
    %c0_12 = arith.constant 0 : index
    %c0_13 = arith.constant 0 : index
    %18 = vector.load %arg6[%c0_12, %c0_13] : memref<128x8xbf16, #tpu.memory_space<vmem>>, vector<128x8xbf16>
    %cst_14 = arith.constant dense<0.000000e+00> : vector<16x8xf32>
    %19 = tpu.matmul %17, %18, %cst_14 {dimension_numbers = #tpu.dot_dimension_numbers<[1], [0], [0], [1], [0, 0, 1, 1], [], []>} : vector<16x128xbf16>, vector<128x8xbf16>, vector<16x8xf32> -> vector<16x8xf32>
    %c0_15 = arith.constant 0 : index
    %c0_16 = arith.constant 0 : index
    %20 = vector.load %arg7[%c0_15, %c0_16] : memref<1x8xf32, #tpu.memory_space<vmem>>, vector<1x8xf32>
    %21 = vector.broadcast %20 : vector<1x8xf32> to vector<16x8xf32>
    %22 = arith.addf %19, %21 : vector<16x8xf32>
    %c0_17 = arith.constant 0 : index
    %c0_18 = arith.constant 0 : index
    %23 = vector.load %arg8[%c0_17, %c0_18] : memref<16x8xf32, #tpu.memory_space<vmem>>, vector<16x8xf32>
    tpu.vector_store %arg8[%c0_17, %c0_18], %22 {strides = array<i32>} : memref<16x8xf32, #tpu.memory_space<vmem>>, vector<16x8xf32>,
    return
  }
  func.func @transform_0(%arg0: i32) -> (i32, i32) {
    %c0_i32 = arith.constant 0 : i32
    %c0_i32_0 = arith.constant 0 : i32
    return %arg0, %c0_i32 : i32, i32
  }
  func.func @transform_1(%arg0: i32) -> (i32, i32) {
    %c0_i32 = arith.constant 0 : i32
    %c0_i32_0 = arith.constant 0 : i32
    %c0_i32_1 = arith.constant 0 : i32
    return %c0_i32, %c0_i32_0 : i32, i32
  }
  func.func @transform_2(%arg0: i32) -> (i32, i32) {
    %c0_i32 = arith.constant 0 : i32
    %c0_i32_0 = arith.constant 0 : i32
    %c0_i32_1 = arith.constant 0 : i32
    return %c0_i32, %c0_i32_0 : i32, i32
  }
  func.func @transform_3(%arg0: i32) -> (i32, i32) {
    %c0_i32 = arith.constant 0 : i32
    %c0_i32_0 = arith.constant 0 : i32
    %c0_i32_1 = arith.constant 0 : i32
    return %c0_i32, %c0_i32_0 : i32, i32
  }
  func.func @transform_4(%arg0: i32) -> (i32, i32) {
    %c0_i32 = arith.constant 0 : i32
    %c0_i32_0 = arith.constant 0 : i32
    %c0_i32_1 = arith.constant 0 : i32
    return %c0_i32, %c0_i32_0 : i32, i32
  }
  func.func @transform_5(%arg0: i32) -> (i32, i32) {
    %c0_i32 = arith.constant 0 : i32
    %c0_i32_0 = arith.constant 0 : i32
    %c0_i32_1 = arith.constant 0 : i32
    return %c0_i32, %c0_i32_0 : i32, i32
  }
  func.func @transform_6(%arg0: i32) -> (i32, i32) {
    %c0_i32 = arith.constant 0 : i32
    %c0_i32_0 = arith.constant 0 : i32
    %c0_i32_1 = arith.constant 0 : i32
    return %c0_i32, %c0_i32_0 : i32, i32
  }
  func.func @transform_7(%arg0: i32) -> (i32, i32) {
    %c0_i32 = arith.constant 0 : i32
    %c0_i32_0 = arith.constant 0 : i32
    return %arg0, %c0_i32 : i32, i32
  }
}

module attributes {stable_mosaic.version = 11 : i64} {
  func.func @_concept_mlp_kernel(%arg0: i32, %arg1: memref<16x32xf32, #tpu.memory_space<vmem>>, %arg2: memref<32x128xbf16, #tpu.memory_space<vmem>>, %arg3: memref<1x128xf32, #tpu.memory_space<vmem>>, %arg4: memref<128x128xbf16, #tpu.memory_space<vmem>>, %arg5: memref<1x128xf32, #tpu.memory_space<vmem>>, %arg6: memref<128x8xbf16, #tpu.memory_space<vmem>>, %arg7: memref<1x8xf32, #tpu.memory_space<vmem>>, %arg8: memref<16x8xf32, #tpu.memory_space<vmem>>) attributes {dimension_semantics = [#tpu.dimension_semantics<parallel>], iteration_bounds = array<i64: 1>, scalar_prefetch = 0 : i64, scratch_operands = 0 : i64, tpu.core_type = #tpu.core_type<tc>, window_params = [{transform_indices = @transform_0, window_bounds = array<i64: 16, 32>}, {pipeline_mode = #tpu.pipeline_mode<synchronous>, transform_indices = @transform_1, window_bounds = array<i64: 32, 128>}, {pipeline_mode = #tpu.pipeline_mode<synchronous>, transform_indices = @transform_2, window_bounds = array<i64: 1, 128>}, {pipeline_mode = #tpu.pipeline_mode<synchronous>, transform_indices = @transform_3, window_bounds = array<i64: 128, 128>}, {pipeline_mode = #tpu.pipeline_mode<synchronous>, transform_indices = @transform_4, window_bounds = array<i64: 1, 128>}, {pipeline_mode = #tpu.pipeline_mode<synchronous>, transform_indices = @transform_5, window_bounds = array<i64: 128, 8>}, {pipeline_mode = #tpu.pipeline_mode<synchronous>, transform_indices = @transform_6, window_bounds = array<i64: 1, 8>}, {transform_indices = @transform_7, window_bounds = array<i64: 16, 8>}]} {
    %c0 = arith.constant 0 : index
    %c0_0 = arith.constant 0 : index
    %0 = vector.load %arg1[%c0, %c0_0] : memref<16x32xf32, #tpu.memory_space<vmem>>, vector<16x32xf32>
    %1 = arith.truncf %0 : vector<16x32xf32> to vector<16x32xbf16>
    %c0_1 = arith.constant 0 : index
    %c0_2 = arith.constant 0 : index
    %2 = vector.load %arg2[%c0_1, %c0_2] : memref<32x128xbf16, #tpu.memory_space<vmem>>, vector<32x128xbf16>
    %cst = arith.constant dense<0.000000e+00> : vector<16x128xf32>
    %3 = tpu.matmul %1, %2, %cst {dimension_numbers = #tpu.dot_dimension_numbers<[1], [0], [0], [1], [0, 0, 1, 1], [], []>} : vector<16x32xbf16>, vector<32x128xbf16>, vector<16x128xf32> -> vector<16x128xf32>
    %c0_3 = arith.constant 0 : index
    %c0_4 = arith.constant 0 : index
    %4 = vector.load %arg3[%c0_3, %c0_4] : memref<1x128xf32, #tpu.memory_space<vmem>>, vector<1x128xf32>
    %5 = vector.broadcast %4 : vector<1x128xf32> to vector<16x128xf32>
    %6 = arith.addf %3, %5 : vector<16x128xf32>
    %cst_5 = arith.constant 0.000000e+00 : f32
    %7 = vector.broadcast %cst_5 : f32 to vector<16x128xf32>
    %8 = arith.maximumf %6, %7 : vector<16x128xf32>
    %9 = arith.truncf %8 : vector<16x128xf32> to vector<16x128xbf16>
    %c0_6 = arith.constant 0 : index
    %c0_7 = arith.constant 0 : index
    %10 = vector.load %arg4[%c0_6, %c0_7] : memref<128x128xbf16, #tpu.memory_space<vmem>>, vector<128x128xbf16>
    %cst_8 = arith.constant dense<0.000000e+00> : vector<16x128xf32>
    %11 = tpu.matmul %9, %10, %cst_8 {dimension_numbers = #tpu.dot_dimension_numbers<[1], [0], [0], [1], [0, 0, 1, 1], [], []>} : vector<16x128xbf16>, vector<128x128xbf16>, vector<16x128xf32> -> vector<16x128xf32>
    %c0_9 = arith.constant 0 : index
    %c0_10 = arith.constant 0 : index
    %12 = vector.load %arg5[%c0_9, %c0_10] : memref<1x128xf32, #tpu.memory_space<vmem>>, vector<1x128xf32>
    %13 = vector.broadcast %12 : vector<1x128xf32> to vector<16x128xf32>
    %14 = arith.addf %11, %13 : vector<16x128xf32>
    %cst_11 = arith.constant 0.000000e+00 : f32
    %15 = vector.broadcast %cst_11 : f32 to vector<16x128xf32>
    %16 = arith.maximumf %14, %15 : vector<16x128xf32>
    %17 = arith.truncf %16 : vector<16x128xf32> to vector<16x128xbf16>
    %c0_12 = arith.constant 0 : index
    %c0_13 = arith.constant 0 : index
    %18 = vector.load %arg6[%c0_12, %c0_13] : memref<128x8xbf16, #tpu.memory_space<vmem>>, vector<128x8xbf16>
    %cst_14 = arith.constant dense<0.000000e+00> : vector<16x8xf32>
    %19 = tpu.matmul %17, %18, %cst_14 {dimension_numbers = #tpu.dot_dimension_numbers<[1], [0], [0], [1], [0, 0, 1, 1], [], []>} : vector<16x128xbf16>, vector<128x8xbf16>, vector<16x8xf32> -> vector<16x8xf32>
    %c0_15 = arith.constant 0 : index
    %c0_16 = arith.constant 0 : index
    %20 = vector.load %arg7[%c0_15, %c0_16] : memref<1x8xf32, #tpu.memory_space<vmem>>, vector<1x8xf32>
    %21 = vector.broadcast %20 : vector<1x8xf32> to vector<16x8xf32>
    %22 = arith.addf %19, %21 : vector<16x8xf32>
    %c0_17 = arith.constant 0 : index
    %c0_18 = arith.constant 0 : index
    %23 = vector.load %arg8[%c0_17, %c0_18] : memref<16x8xf32, #tpu.memory_space<vmem>>, vector<16x8xf32>
    tpu.vector_store %arg8[%c0_17, %c0_18], %22 {strides = array<i32>} : memref<16x8xf32, #tpu.memory_space<vmem>>, vector<16x8xf32>,
    return
  }
  func.func @transform_0(%arg0: i32) -> (i32, i32) {
    %c0_i32 = arith.constant 0 : i32
    %c0_i32_0 = arith.constant 0 : i32
    return %arg0, %c0_i32 : i32, i32
  }
  func.func @transform_1(%arg0: i32) -> (i32, i32) {
    %c0_i32 = arith.constant 0 : i32
    %c0_i32_0 = arith.constant 0 : i32
    %c0_i32_1 = arith.constant 0 : i32
    return %c0_i32, %c0_i32_0 : i32, i32
  }
  func.func @transform_2(%arg0: i32) -> (i32, i32) {
    %c0_i32 = arith.constant 0 : i32
    %c0_i32_0 = arith.constant 0 : i32
    %c0_i32_1 = arith.constant 0 : i32
    return %c0_i32, %c0_i32_0 : i32, i32
  }
  func.func @transform_3(%arg0: i32) -> (i32, i32) {
    %c0_i32 = arith.constant 0 : i32
    %c0_i32_0 = arith.constant 0 : i32
    %c0_i32_1 = arith.constant 0 : i32
    return %c0_i32, %c0_i32_0 : i32, i32
  }
  func.func @transform_4(%arg0: i32) -> (i32, i32) {
    %c0_i32 = arith.constant 0 : i32
    %c0_i32_0 = arith.constant 0 : i32
    %c0_i32_1 = arith.constant 0 : i32
    return %c0_i32, %c0_i32_0 : i32, i32
  }
  func.func @transform_5(%arg0: i32) -> (i32, i32) {
    %c0_i32 = arith.constant 0 : i32
    %c0_i32_0 = arith.constant 0 : i32
    %c0_i32_1 = arith.constant 0 : i32
    return %c0_i32, %c0_i32_0 : i32, i32
  }
  func.func @transform_6(%arg0: i32) -> (i32, i32) {
    %c0_i32 = arith.constant 0 : i32
    %c0_i32_0 = arith.constant 0 : i32
    %c0_i32_1 = arith.constant 0 : i32
    return %c0_i32, %c0_i32_0 : i32, i32
  }
  func.func @transform_7(%arg0: i32) -> (i32, i32) {
    %c0_i32 = arith.constant 0 : i32
    %c0_i32_0 = arith.constant 0 : i32
    return %arg0, %c0_i32 : i32, i32
  }
}

</mosaic_0001>

<bundles_post_ra>
// kernel: tpu_custom_call.1
= control target key start
LH: loop header
LB: loop body
LE: loop exit
PB: predicated region body
PF: predicated region fallthrough
CT: control target
= control target key end

     0   :  { %12 = vsyncpa [#allocation3], 0  ;;  %s667_s0 = inlined_call_operand.hbm [shape: f32[16,32], index: 0, kind: input, shape index: {}]   ;;  %s668_s1 = inlined_call_operand.hbm [shape: bf16[32,128], index: 1, kind: input, shape index: {}]   ;;  %s669_s2 = inlined_call_operand.vmem [shape: f32[1,128], index: 2, kind: input, shape index: {}]   ;;  %s670_s3 = inlined_call_operand.vmem [shape: bf16[128,128], index: 3, kind: input, shape index: {}]   ;;  %s671_s4 = inlined_call_operand.vmem [shape: f32[1,128], index: 4, kind: input, shape index: {}]   ;;  %s672_s5 = inlined_call_operand.vmem [shape: bf16[128,8], index: 5, kind: input, shape index: {}]   ;;  %s673_s6 = inlined_call_operand.vmem [shape: f32[1,8], index: 6, kind: input, shape index: {}]   ;;  %s674_s7 = inlined_call_operand.vmem [shape: f32[16,8], index: 7, kind: output, shape index: {}]  }
   0x1   :  { %13 = vsyncpa [#allocation5], 0  ;;  %s526_s24 = smov [#allocation2]  }
   0x2   :  { %s19_s25 = sshll.u32 %s526_s24, 4  ;;  %s20_s25 = int_to_ptr.vmem [resolvable:$true] %s19_s25 }
   0x3   :  { %s490_s26 = scalar_lea.vmem %s20_s25, 256  ;;  %p495_p1 = scmp.lt.s32.totalorder %s20_s25, %s20_s25 }
   0x4   :  { %p491_p0 = scmp.ne.s32.totalorder %s20_s25, %s490_s26  ;;  %p496_p2 = scmp.lt.s32.totalorder %s490_s26, %s490_s26 }
   0x6   :  { %p497_p3 = por %p496_p2, %p495_p1 }
   0x8   :  { %p498_p4 = pnand %p497_p3, %p491_p0 }
   0xa   :  { %501 = shalt.err (!%p498_p4)
}
   0xb   :  { %s527_s27 = smov 128   ;;  %s528_s28 = smov 8  }
   0xc   :  { %25 = dma.hbm_to_vmem [thread:$0]  %s667_s0, 256, %s20_s25, [#allocation3], %s527_s27, %s527_s27, %s528_s28  }
   0xd   :  { %s529_s8 = smov [#allocation4]  }
   0xe   :  { %s31_s9 = sshll.u32 %s529_s8, 4  ;;  %s32_s9 = int_to_ptr.vmem [resolvable:$true] %s31_s9 }
   0xf   :  { %s510_s10 = scalar_lea.vmem %s32_s9, 256  ;;  %p515_p6 = scmp.lt.s32.totalorder %s32_s9, %s32_s9 }
  0x10   :  { %p511_p5 = scmp.ne.s32.totalorder %s32_s9, %s510_s10  ;;  %p516_p7 = scmp.lt.s32.totalorder %s510_s10, %s510_s10 }
  0x12   :  { %p517_p8 = por %p516_p7, %p515_p6 }
  0x14   :  { %p518_p9 = pnand %p517_p8, %p511_p5 }
  0x16   :  { %521 = shalt.err (!%p518_p9)
}
  0x17   :  { %s530_s11 = smov 64   ;;  %s531_s12 = smov 4  }
  0x18   :  { %37 = dma.hbm_to_vmem [thread:$0]  %s668_s1, 256, %s32_s9, [#allocation5], %s530_s11, %s530_s11, %s531_s12  }
  0x19   :  { %522 = dma.done.wait [#allocation3], 256  }
  0x1a   :  { %523 = vsyncadd [#allocation3], 4294967040 }
  0x1b   :  { %524 = dma.done.wait [#allocation5], 256  }
  0x1c   :  { %525 = vsyncadd [#allocation5], 4294967040  ;;  %v532_v0 = vmov 0.0   ;;  %vm533_vm0 = vmmov 0   ;;  %v464_v1 = vld [vmem:[#allocation4 + $0x8] sm:$0xff]   ;;  %v465_v2 = vld [vmem:[#allocation4] sm:$0xff]  }
  0x1d   :  { %408 = vmatprep.subr.bf16.mxu0 %v532_v0  ;;  %412 = vmatprep.mubr.msk.bf16.mxu0 %vm533_vm0, %v532_v0  ;;  %v55_v3 = vld [vmem:[#allocation2] sm:$0xff]  ;;  %v56_v4 = vld [vmem:[#allocation2 + $0x8] sm:$0xff]  ;;  %v466_v5 = vld [vmem:[%s670_s3 + $0x38] sm:$0xff]   ;;  %vm81_vm1 = vcmask 261120   ;;  %vm356_vm2 = vcmask 64512  }
  0x1e   :  { %416 = vmatprep.subr.bf16.mxu1 %v532_v0  ;;  %432 = vmatprep.mubr.msk.bf16.mxu1 %vm533_vm0, %v532_v0  ;;  %v57_v6 = vpack.c.bf16 %v56_v4, %v55_v3  ;;  %v467_v7 = vld [vmem:[%s670_s3 + $0x30] sm:$0xff]   ;;  %v468_v8 = vld [vmem:[%s670_s3 + $0x28] sm:$0xff]   ;;  %v469_v9 = vld [vmem:[%s670_s3 + $0x20] sm:$0xff]  }
  0x1f   :  { %409 = vmatpush3.bf16.msra.mxu0 %v464_v1  ;;  %417 = vmatpush3.bf16.msra.mxu1 %v466_v5  ;;  %v470_v10 = vld [vmem:[%s670_s3 + $0x18] sm:$0xff]   ;;  %v471_v11 = vld [vmem:[%s670_s3 + $0x10] sm:$0xff]   ;;  %v472_v12 = vld [vmem:[%s670_s3 + $0x8] sm:$0xff]  }
  0x20   :  { %410 = vmatprep.subr.bf16.mxu0 %v532_v0  ;;  %418 = vmatprep.subr.bf16.mxu1 %v532_v0  ;;  %v473_v13 = vld [vmem:[%s670_s3] sm:$0xff]   ;;  %v474_v14 = vld [vmem:[%s672_s5 + $0x38] sm:$0xff]   ;;  %v475_v15 = vld [vmem:[%s672_s5 + $0x30] sm:$0xff]  }
  0x21   :  { %v476_v16 = vld [vmem:[%s672_s5 + $0x28] sm:$0xff]   ;;  %v477_v17 = vld [vmem:[%s672_s5 + $0x20] sm:$0xff]   ;;  %v478_v18 = vld [vmem:[%s672_s5 + $0x18] sm:$0xff]  }
  0x22   :  { %v365_v19 = vld [vmem:[%s669_s2] ss:$0 sm:$0xff]  ;;  %v479_v29 = vld [vmem:[%s672_s5 + $0x10] sm:$0xff]   ;;  %v480_v30 = vld [vmem:[%s672_s5 + $0x8] sm:$0xff]  }
  0x23   :  { %411 = vmatpush3.bf16.msra.mxu0 %v465_v2  ;;  %419 = vmatpush3.bf16.msra.mxu1 %v467_v7  ;;  %v481_v31 = vld [vmem:[%s672_s5] sm:$0xff]  }
  0x24   :  { %436 = vmatprep.subr.bf16.mxu0 %v532_v0  ;;  %420 = vmatprep.subr.bf16.mxu1 %v532_v0  ;;  %v369_v32 = vld [vmem:[%s671_s4] ss:$0 sm:$0xff] }
  0x25   :  { %v378_v42 = vld [vmem:[%s673_s6] ss:$0 sm:$0xff] }
  0x26   :  { %413 = vmatmul.mubr.msk.bf16.vlgmr.msra.gmra.mxu0 %vm81_vm1, %v57_v6 }
  0x27   :  { %452 = vmatprep.mubr.msk.bf16.mxu0 %vm533_vm0, %v532_v0  ;;  %421 = vmatpush3.bf16.msra.mxu1 %v468_v8 }
  0x28   :  { %422 = vmatprep.subr.bf16.mxu1 %v532_v0  ;;  %437 = vmatpush3.bf16.msra.mxu0 %v474_v14 }
  0x29   :  { %438 = vmatprep.subr.bf16.mxu0 %v532_v0 }
  0x2b   :  { %423 = vmatpush3.bf16.msra.mxu1 %v469_v9 }
  0x2c   :  { %424 = vmatprep.subr.bf16.mxu1 %v532_v0  ;;  %439 = vmatpush3.bf16.msra.mxu0 %v475_v15 }
  0x2d   :  { %440 = vmatprep.subr.bf16.mxu0 %v532_v0 }
  0x2f   :  { %425 = vmatpush3.bf16.msra.mxu1 %v470_v10 }
  0x30   :  { %426 = vmatprep.subr.bf16.mxu1 %v532_v0  ;;  %441 = vmatpush3.bf16.msra.mxu0 %v476_v16 }
  0x31   :  { %442 = vmatprep.subr.bf16.mxu0 %v532_v0 }
  0x33   :  { %427 = vmatpush3.bf16.msra.mxu1 %v471_v11 }
  0x34   :  { %428 = vmatprep.subr.bf16.mxu1 %v532_v0  ;;  %443 = vmatpush3.bf16.msra.mxu0 %v477_v17 }
  0x35   :  { %444 = vmatprep.subr.bf16.mxu0 %v532_v0 }
  0x37   :  { %429 = vmatpush3.bf16.msra.mxu1 %v472_v12 }
  0x38   :  { %430 = vmatprep.subr.bf16.mxu1 %v532_v0  ;;  %445 = vmatpush3.bf16.msra.mxu0 %v478_v18 }
  0x39   :  { %446 = vmatprep.subr.bf16.mxu0 %v532_v0 }
  0x3b   :  { %431 = vmatpush3.bf16.msra.mxu1 %v473_v13 }
  0x3c   :  { %447 = vmatpush3.bf16.msra.mxu0 %v479_v29 }
  0x3d   :  { %448 = vmatprep.subr.bf16.mxu0 %v532_v0 }
  0x40   :  { %449 = vmatpush3.bf16.msra.mxu0 %v480_v30 }
  0x41   :  { %450 = vmatprep.subr.bf16.mxu0 %v532_v0 }
  0x44   :  { %451 = vmatpush3.bf16.msra.mxu0 %v481_v31 }
  0xe6   :  { %v119_v20 = vpop.f32.mrf.mxu0 }
  0xe7   :  { %v120_v22 = vadd.f32 %v365_v19, %v119_v20 }
  0xe8   :  { %v414_v21 = vpop.f32.mrf.mxu0 }
  0xe9   :  { %v126_v26 = vmax.f32 %v120_v22, 0.0 }
  0xea   :  { %v122_v23 = vpop.f32.mrf.mxu0 }
  0xeb   :  { %v123_v24 = vadd.f32 %v365_v19, %v122_v23 }
  0xec   :  { %v415_v25 = vpop.f32.mrf.mxu0 }
  0xed   :  { %v127_v27 = vmax.f32 %v123_v24, 0.0 }
  0xef   :  { %v128_v28 = vpack.c.bf16 %v127_v27, %v126_v26 }
  0xf1   :  { %433 = vmatmul.mubr.bf16.vlgmr.msra.gmra.mxu1 %v128_v28 }
 0x1b1   :  { %v234_v33 = vpop.f32.mrf.mxu1 }
 0x1b2   :  { %v235_v35 = vadd.f32 %v369_v32, %v234_v33 }
 0x1b3   :  { %v434_v34 = vpop.f32.mrf.mxu1 }
 0x1b4   :  { %v241_v39 = vmax.f32 %v235_v35, 0.0 }
 0x1b5   :  { %v237_v36 = vpop.f32.mrf.mxu1 }
 0x1b6   :  { %v238_v37 = vadd.f32 %v369_v32, %v237_v36 }
 0x1b7   :  { %v435_v38 = vpop.f32.mrf.mxu1 }
 0x1b8   :  { %v242_v40 = vmax.f32 %v238_v37, 0.0 }
 0x1ba   :  { %v243_v41 = vpack.c.bf16 %v242_v40, %v241_v39 }
 0x1bc   :  { %453 = vmatmul.mubr.bf16.vlgmr.msra.gmra.mxu0 %v243_v41 }
 0x27c   :  { %v349_v43 = vpop.f32.mrf.mxu0 }
 0x27d   :  { %v350_v44 = vadd.f32 %v378_v42, %v349_v43 }
 0x27e   :  { %v454_v45 = vpop.f32.mrf.mxu0 }
 0x27f   :  { %357 = vst.msk [vmem:[%s674_s7] sm:$0xff] %vm356_vm2, %v350_v44 }
 0x280   :  { %v352_v46 = vpop.f32.mrf.mxu0 }
 0x281   :  { %v353_v47 = vadd.f32 %v378_v42, %v352_v46 }
 0x282   :  { %v455_v48 = vpop.f32.mrf.mxu0 }
 0x283   :  { %358 = vst.msk [vmem:[%s674_s7 + $0x8] sm:$0xff] %vm356_vm2, %v353_v47 }
 0x284   :  { %363 = vsyncpa [#allocation3], 1 }
 0x285   :  { %364 = vsyncpa [#allocation5], 1 }

// kernel: tpu_custom_call.1
= control target key start
LH: loop header
LB: loop body
LE: loop exit
PB: predicated region body
PF: predicated region fallthrough
CT: control target
= control target key end

     0   :  { %12 = vsyncpa [#allocation3], 0  ;;  %s667_s0 = inlined_call_operand.hbm [shape: f32[16,32], index: 0, kind: input, shape index: {}]   ;;  %s668_s1 = inlined_call_operand.hbm [shape: bf16[32,128], index: 1, kind: input, shape index: {}]   ;;  %s669_s2 = inlined_call_operand.vmem [shape: f32[1,128], index: 2, kind: input, shape index: {}]   ;;  %s670_s3 = inlined_call_operand.vmem [shape: bf16[128,128], index: 3, kind: input, shape index: {}]   ;;  %s671_s4 = inlined_call_operand.vmem [shape: f32[1,128], index: 4, kind: input, shape index: {}]   ;;  %s672_s5 = inlined_call_operand.vmem [shape: bf16[128,8], index: 5, kind: input, shape index: {}]   ;;  %s673_s6 = inlined_call_operand.vmem [shape: f32[1,8], index: 6, kind: input, shape index: {}]   ;;  %s674_s7 = inlined_call_operand.vmem [shape: f32[16,8], index: 7, kind: output, shape index: {}]  }
   0x1   :  { %13 = vsyncpa [#allocation5], 0  ;;  %s526_s24 = smov [#allocation2]  }
   0x2   :  { %s19_s25 = sshll.u32 %s526_s24, 4  ;;  %s20_s25 = int_to_ptr.vmem [resolvable:$true] %s19_s25 }
   0x3   :  { %s490_s26 = scalar_lea.vmem %s20_s25, 256  ;;  %p495_p1 = scmp.lt.s32.totalorder %s20_s25, %s20_s25 }
   0x4   :  { %p491_p0 = scmp.ne.s32.totalorder %s20_s25, %s490_s26  ;;  %p496_p2 = scmp.lt.s32.totalorder %s490_s26, %s490_s26 }
   0x6   :  { %p497_p3 = por %p496_p2, %p495_p1 }
   0x8   :  { %p498_p4 = pnand %p497_p3, %p491_p0 }
   0xa   :  { %501 = shalt.err (!%p498_p4)
}
   0xb   :  { %s527_s27 = smov 128   ;;  %s528_s28 = smov 8  }
   0xc   :  { %25 = dma.hbm_to_vmem [thread:$0]  %s667_s0, 256, %s20_s25, [#allocation3], %s527_s27, %s527_s27, %s528_s28  }
   0xd   :  { %s529_s8 = smov [#allocation4]  }
   0xe   :  { %s31_s9 = sshll.u32 %s529_s8, 4  ;;  %s32_s9 = int_to_ptr.vmem [resolvable:$true] %s31_s9 }
   0xf   :  { %s510_s10 = scalar_lea.vmem %s32_s9, 256  ;;  %p515_p6 = scmp.lt.s32.totalorder %s32_s9, %s32_s9 }
  0x10   :  { %p511_p5 = scmp.ne.s32.totalorder %s32_s9, %s510_s10  ;;  %p516_p7 = scmp.lt.s32.totalorder %s510_s10, %s510_s10 }
  0x12   :  { %p517_p8 = por %p516_p7, %p515_p6 }
  0x14   :  { %p518_p9 = pnand %p517_p8, %p511_p5 }
  0x16   :  { %521 = shalt.err (!%p518_p9)
}
  0x17   :  { %s530_s11 = smov 64   ;;  %s531_s12 = smov 4  }
  0x18   :  { %37 = dma.hbm_to_vmem [thread:$0]  %s668_s1, 256, %s32_s9, [#allocation5], %s530_s11, %s530_s11, %s531_s12  }
  0x19   :  { %522 = dma.done.wait [#allocation3], 256  }
  0x1a   :  { %523 = vsyncadd [#allocation3], 4294967040 }
  0x1b   :  { %524 = dma.done.wait [#allocation5], 256  }
  0x1c   :  { %525 = vsyncadd [#allocation5], 4294967040  ;;  %v532_v0 = vmov 0.0   ;;  %vm533_vm0 = vmmov 0   ;;  %v464_v1 = vld [vmem:[#allocation4 + $0x8] sm:$0xff]   ;;  %v465_v2 = vld [vmem:[#allocation4] sm:$0xff]  }
  0x1d   :  { %408 = vmatprep.subr.bf16.mxu0 %v532_v0  ;;  %412 = vmatprep.mubr.msk.bf16.mxu0 %vm533_vm0, %v532_v0  ;;  %v55_v3 = vld [vmem:[#allocation2] sm:$0xff]  ;;  %v56_v4 = vld [vmem:[#allocation2 + $0x8] sm:$0xff]  ;;  %v466_v5 = vld [vmem:[%s670_s3 + $0x38] sm:$0xff]   ;;  %vm81_vm1 = vcmask 261120   ;;  %vm356_vm2 = vcmask 64512  }
  0x1e   :  { %416 = vmatprep.subr.bf16.mxu1 %v532_v0  ;;  %432 = vmatprep.mubr.msk.bf16.mxu1 %vm533_vm0, %v532_v0  ;;  %v57_v6 = vpack.c.bf16 %v56_v4, %v55_v3  ;;  %v467_v7 = vld [vmem:[%s670_s3 + $0x30] sm:$0xff]   ;;  %v468_v8 = vld [vmem:[%s670_s3 + $0x28] sm:$0xff]   ;;  %v469_v9 = vld [vmem:[%s670_s3 + $0x20] sm:$0xff]  }
  0x1f   :  { %409 = vmatpush3.bf16.msra.mxu0 %v464_v1  ;;  %417 = vmatpush3.bf16.msra.mxu1 %v466_v5  ;;  %v470_v10 = vld [vmem:[%s670_s3 + $0x18] sm:$0xff]   ;;  %v471_v11 = vld [vmem:[%s670_s3 + $0x10] sm:$0xff]   ;;  %v472_v12 = vld [vmem:[%s670_s3 + $0x8] sm:$0xff]  }
  0x20   :  { %410 = vmatprep.subr.bf16.mxu0 %v532_v0  ;;  %418 = vmatprep.subr.bf16.mxu1 %v532_v0  ;;  %v473_v13 = vld [vmem:[%s670_s3] sm:$0xff]   ;;  %v474_v14 = vld [vmem:[%s672_s5 + $0x38] sm:$0xff]   ;;  %v475_v15 = vld [vmem:[%s672_s5 + $0x30] sm:$0xff]  }
  0x21   :  { %v476_v16 = vld [vmem:[%s672_s5 + $0x28] sm:$0xff]   ;;  %v477_v17 = vld [vmem:[%s672_s5 + $0x20] sm:$0xff]   ;;  %v478_v18 = vld [vmem:[%s672_s5 + $0x18] sm:$0xff]  }
  0x22   :  { %v365_v19 = vld [vmem:[%s669_s2] ss:$0 sm:$0xff]  ;;  %v479_v29 = vld [vmem:[%s672_s5 + $0x10] sm:$0xff]   ;;  %v480_v30 = vld [vmem:[%s672_s5 + $0x8] sm:$0xff]  }
  0x23   :  { %411 = vmatpush3.bf16.msra.mxu0 %v465_v2  ;;  %419 = vmatpush3.bf16.msra.mxu1 %v467_v7  ;;  %v481_v31 = vld [vmem:[%s672_s5] sm:$0xff]  }
  0x24   :  { %436 = vmatprep.subr.bf16.mxu0 %v532_v0  ;;  %420 = vmatprep.subr.bf16.mxu1 %v532_v0  ;;  %v369_v32 = vld [vmem:[%s671_s4] ss:$0 sm:$0xff] }
  0x25   :  { %v378_v42 = vld [vmem:[%s673_s6] ss:$0 sm:$0xff] }
  0x26   :  { %413 = vmatmul.mubr.msk.bf16.vlgmr.msra.gmra.mxu0 %vm81_vm1, %v57_v6 }
  0x27   :  { %452 = vmatprep.mubr.msk.bf16.mxu0 %vm533_vm0, %v532_v0  ;;  %421 = vmatpush3.bf16.msra.mxu1 %v468_v8 }
  0x28   :  { %422 = vmatprep.subr.bf16.mxu1 %v532_v0  ;;  %437 = vmatpush3.bf16.msra.mxu0 %v474_v14 }
  0x29   :  { %438 = vmatprep.subr.bf16.mxu0 %v532_v0 }
  0x2b   :  { %423 = vmatpush3.bf16.msra.mxu1 %v469_v9 }
  0x2c   :  { %424 = vmatprep.subr.bf16.mxu1 %v532_v0  ;;  %439 = vmatpush3.bf16.msra.mxu0 %v475_v15 }
  0x2d   :  { %440 = vmatprep.subr.bf16.mxu0 %v532_v0 }
  0x2f   :  { %425 = vmatpush3.bf16.msra.mxu1 %v470_v10 }
  0x30   :  { %426 = vmatprep.subr.bf16.mxu1 %v532_v0  ;;  %441 = vmatpush3.bf16.msra.mxu0 %v476_v16 }
  0x31   :  { %442 = vmatprep.subr.bf16.mxu0 %v532_v0 }
  0x33   :  { %427 = vmatpush3.bf16.msra.mxu1 %v471_v11 }
  0x34   :  { %428 = vmatprep.subr.bf16.mxu1 %v532_v0  ;;  %443 = vmatpush3.bf16.msra.mxu0 %v477_v17 }
  0x35   :  { %444 = vmatprep.subr.bf16.mxu0 %v532_v0 }
  0x37   :  { %429 = vmatpush3.bf16.msra.mxu1 %v472_v12 }
  0x38   :  { %430 = vmatprep.subr.bf16.mxu1 %v532_v0  ;;  %445 = vmatpush3.bf16.msra.mxu0 %v478_v18 }
  0x39   :  { %446 = vmatprep.subr.bf16.mxu0 %v532_v0 }
  0x3b   :  { %431 = vmatpush3.bf16.msra.mxu1 %v473_v13 }
  0x3c   :  { %447 = vmatpush3.bf16.msra.mxu0 %v479_v29 }
  0x3d   :  { %448 = vmatprep.subr.bf16.mxu0 %v532_v0 }
  0x40   :  { %449 = vmatpush3.bf16.msra.mxu0 %v480_v30 }
  0x41   :  { %450 = vmatprep.subr.bf16.mxu0 %v532_v0 }
  0x44   :  { %451 = vmatpush3.bf16.msra.mxu0 %v481_v31 }
  0xe6   :  { %v119_v20 = vpop.f32.mrf.mxu0 }
  0xe7   :  { %v120_v22 = vadd.f32 %v365_v19, %v119_v20 }
  0xe8   :  { %v414_v21 = vpop.f32.mrf.mxu0 }
  0xe9   :  { %v126_v26 = vmax.f32 %v120_v22, 0.0 }
  0xea   :  { %v122_v23 = vpop.f32.mrf.mxu0 }
  0xeb   :  { %v123_v24 = vadd.f32 %v365_v19, %v122_v23 }
  0xec   :  { %v415_v25 = vpop.f32.mrf.mxu0 }
  0xed   :  { %v127_v27 = vmax.f32 %v123_v24, 0.0 }
  0xef   :  { %v128_v28 = vpack.c.bf16 %v127_v27, %v126_v26 }
  0xf1   :  { %433 = vmatmul.mubr.bf16.vlgmr.msra.gmra.mxu1 %v128_v28 }
 0x1b1   :  { %v234_v33 = vpop.f32.mrf.mxu1 }
 0x1b2   :  { %v235_v35 = vadd.f32 %v369_v32, %v234_v33 }
 0x1b3   :  { %v434_v34 = vpop.f32.mrf.mxu1 }
 0x1b4   :  { %v241_v39 = vmax.f32 %v235_v35, 0.0 }
 0x1b5   :  { %v237_v36 = vpop.f32.mrf.mxu1 }
 0x1b6   :  { %v238_v37 = vadd.f32 %v369_v32, %v237_v36 }
 0x1b7   :  { %v435_v38 = vpop.f32.mrf.mxu1 }
 0x1b8   :  { %v242_v40 = vmax.f32 %v238_v37, 0.0 }
 0x1ba   :  { %v243_v41 = vpack.c.bf16 %v242_v40, %v241_v39 }
 0x1bc   :  { %453 = vmatmul.mubr.bf16.vlgmr.msra.gmra.mxu0 %v243_v41 }
 0x27c   :  { %v349_v43 = vpop.f32.mrf.mxu0 }
 0x27d   :  { %v350_v44 = vadd.f32 %v378_v42, %v349_v43 }
 0x27e   :  { %v454_v45 = vpop.f32.mrf.mxu0 }
 0x27f   :  { %357 = vst.msk [vmem:[%s674_s7] sm:$0xff] %vm356_vm2, %v350_v44 }
 0x280   :  { %v352_v46 = vpop.f32.mrf.mxu0 }
 0x281   :  { %v353_v47 = vadd.f32 %v378_v42, %v352_v46 }
 0x282   :  { %v455_v48 = vpop.f32.mrf.mxu0 }
 0x283   :  { %358 = vst.msk [vmem:[%s674_s7 + $0x8] sm:$0xff] %vm356_vm2, %v353_v47 }
 0x284   :  { %363 = vsyncpa [#allocation3], 1 }
 0x285   :  { %364 = vsyncpa [#allocation5], 1 }

</bundles_post_ra>
